<compile_context>
chip_gen: v7x
topology: tpu7x:2x2x1
jax: 0.10.0
libtpu: 0.0.40
codegen_flags: <defaults>
</compile_context>

<pallas_src>
import math

import jax
import jax.numpy as jnp
from jax.experimental import pallas as pl
from jax.experimental.pallas import tpu as pltpu

ENC_OUT_DIM = 512
LATENT_DIM = 64
IN_DIM = 32 * 32            # 1024 (layer-1 input features in the PyTorch module)
HID_DIM = 16 * 16           # 256
HEAD_DIM = 2 * LATENT_DIM   # fused mu|log_var head -> lane-dense 128-wide output

# 512 rows/step: big enough to amortize per-grid-step overhead and per-step MXU
# weight pushes on v6e/v7x, small enough that v5e's single vector-store slot
# (f32 h1/h2 intermediates round-trip VMEM) stays off the critical path.
# Per-step VMEM footprint is only a few MiB on every generation.
TILE_B_MAX = 512


def _encoder_kernel(x_ref, w1_ref, b1_ref, w2_ref, b2_ref, wh_ref, bh_ref, out_ref):
    # x tile / weights: bf16 (MXU inputs); biases, accumulation, epilogue: f32.
    x = x_ref[...]                                                   # (TB, K) bf16

    # Layer 1: Linear(K -> 256) + LeakyReLU(0.2)  (upsample already folded into w1)
    h1 = jnp.dot(x, w1_ref[...], preferred_element_type=jnp.float32) + b1_ref[...]
    h1 = jnp.maximum(h1, 0.2 * h1)

    # Layer 2: Linear(256 -> 512) + LeakyReLU(0.2)
    h2 = jnp.dot(h1.astype(jnp.bfloat16), w2_ref[...],
                 preferred_element_type=jnp.float32) + b2_ref[...]
    h2 = jnp.maximum(h2, 0.2 * h2)

    # Fused heads: one (512, 128) matmul; lanes [0:64]=mu, [64:128]=log_var.
    head = jnp.dot(h2.astype(jnp.bfloat16), wh_ref[...],
                   preferred_element_type=jnp.float32) + bh_ref[...]
    # (1, 128) lane mask broadcast across the batch tile; exp argument is
    # zeroed on the mu lanes so the discarded branch can never overflow.
    lane = jax.lax.broadcasted_iota(jnp.int32, (1, HEAD_DIM), 1)
    is_mu = lane < LATENT_DIM
    std = jnp.exp(jnp.where(is_mu, 0.0, head) * 0.5)
    out_ref[...] = jnp.where(is_mu, head, std)                       # 128-lane dense


def _round_up(x, m):
    return ((x + m - 1) // m) * m


def prepare_encoder_params(params, in_hw):
    """One-time (load-time) parameter preparation. NOT part of the hot path.

    Folds F.interpolate(mode='nearest', size=(32,32)) + flatten into w1,
    fuses the mu/log_var heads into one (512, 128) matrix, and casts weights
    to bf16 / biases to f32.
    """
    w1, b1, w2, b2, wmu, bmu, wlv, blv = params
    H, W = in_hw

    # Legacy-nearest index (F.interpolate default): src = floor(dst * in / out).
    # The resize only duplicates/selects source pixels, so
    #   (x_upsampled_flat @ w1) == (x_flat @ w1_folded)
    # with w1_folded[src, :] = sum of w1 rows whose destination maps to src.
    # NOTE: valid for mode='nearest' only (not 'nearest-exact' / align_corners).
    rows = (jnp.arange(32) * H) // 32
    cols = (jnp.arange(32) * W) // 32
    src = (rows[:, None] * W + cols[None, :]).reshape(-1)            # (1024,)
    w1_folded = jnp.zeros((H * W, HID_DIM), jnp.float32).at[src].add(
        w1.astype(jnp.float32))

    wh = jnp.concatenate([wmu, wlv], axis=1)                         # (512, 128)
    bh = jnp.concatenate([bmu, blv], axis=1)                         # (1, 128)

    return (
        w1_folded.astype(jnp.bfloat16),   # (H*W, 256)
        b1.astype(jnp.float32),           # (1, 256)
        w2.astype(jnp.bfloat16),          # (256, 512)
        b2.astype(jnp.float32),           # (1, 512)
        wh.astype(jnp.bfloat16),          # (512, 128)
        bh.astype(jnp.float32),           # (1, 128)
    )


def encoder_forward(x_nchw, prepared):
    """x_nchw: (B, 1, H, W). `prepared` from prepare_encoder_params.

    Returns (mu, std), each (B, LATENT_DIM) float32.
    """
    w1_b, b1_f, w2_b, b2_f, wh_b, bh_f = prepared
    B, C, H, W = x_nchw.shape
    assert C == 1, "Encoder's Linear(32*32, ...) implies a single input channel"
    K = H * W
    assert w1_b.shape[0] == K, "prepared params were built for a different H, W"

    # Only the activation is touched in the hot path (cheap cast + pad).
    x_flat = x_nchw.reshape(B, K).astype(jnp.bfloat16)               # (B, H*W)

    # Balanced batch tiling: at most ~15 padded rows per tile, >=2 grid steps
    # when there is enough work so v7x's second TensorCore isn't idle.
    num_tiles = max(-(-B // TILE_B_MAX), 1)
    if num_tiles == 1 and B >= 32:
        num_tiles = 2
    tile_b = _round_up(-(-B // num_tiles), 16)   # multiple of 16: bf16 sublane-dense
    B_pad = num_tiles * tile_b
    if B_pad != B:
        x_flat = jnp.pad(x_flat, ((0, B_pad - B), (0, 0)))

    const = lambda i: (0, 0)   # weights/biases: same block every step -> resident
    out = pl.pallas_call(
        _encoder_kernel,
        out_shape=jax.ShapeDtypeStruct((B_pad, HEAD_DIM), jnp.float32),
        grid=(num_tiles,),
        in_specs=[
            pl.BlockSpec((tile_b, K), lambda i: (i, 0)),             # x tile
            pl.BlockSpec((K, HID_DIM), const),                       # w1 (folded)
            pl.BlockSpec((1, HID_DIM), const),                       # b1
            pl.BlockSpec((HID_DIM, ENC_OUT_DIM), const),             # w2
            pl.BlockSpec((1, ENC_OUT_DIM), const),                   # b2
            pl.BlockSpec((ENC_OUT_DIM, HEAD_DIM), const),            # w_head (mu|lv)
            pl.BlockSpec((1, HEAD_DIM), const),                      # b_head
        ],
        out_specs=pl.BlockSpec((tile_b, HEAD_DIM), lambda i: (i, 0)),
        compiler_params=pltpu.CompilerParams(
            dimension_semantics=("parallel",)),
    )(x_flat, w1_b, b1_f, w2_b, b2_f, wh_b, bh_f)

    mu = out[:B, :LATENT_DIM]
    std = out[:B, LATENT_DIM:]
    return mu, std


def _init_linear(key, fan_in, fan_out):
    """Deterministic init matching nn.Linear's default (U[-1/sqrt(fan_in), ...]).

    Returned weight is (fan_in, fan_out) == PyTorch weight transposed; bias is
    kept 2-D (1, fan_out) so it broadcasts cleanly on TPU.
    """
    kw, kb = jax.random.split(key)
    bound = 1.0 / math.sqrt(fan_in)
    w = jax.random.uniform(kw, (fan_in, fan_out), jnp.float32, -bound, bound)
    b = jax.random.uniform(kb, (1, fan_out), jnp.float32, -bound, bound)
    return w, b


if __name__ == "__main__":
    key = jax.random.PRNGKey(0)
    k1, k2, k3, k4, kx = jax.random.split(key, 5)

    w1, b1 = _init_linear(k1, IN_DIM, HID_DIM)        # Linear(1024, 256)
    w2, b2 = _init_linear(k2, HID_DIM, ENC_OUT_DIM)   # Linear(256, 512)
    wmu, bmu = _init_linear(k3, ENC_OUT_DIM, LATENT_DIM)
    wlv, blv = _init_linear(k4, ENC_OUT_DIM, LATENT_DIM)
    params = (w1, b1, w2, b2, wmu, bmu, wlv, blv)

    # Small input consistent with the module: batch=2, 1 channel, 16x16 spatial.
    x = jax.random.normal(kx, (2, 1, 16, 16), jnp.float32)

    # One-time parameter prep (fold + head fuse + casts), then a jitted forward.
    prepared = prepare_encoder_params(params, (16, 16))
    prepared = jax.tree_util.tree_map(jax.block_until_ready, prepared)
    fwd = jax.jit(encoder_forward)

    mu, std = fwd(x, prepared)
    jax.block_until_ready((mu, std))
    assert mu.shape == (2, LATENT_DIM) and std.shape == (2, LATENT_DIM)

    # Sanity: pure-JAX f32 reference of the original (upsample + f32 MLP) path.
    # Kernel uses bf16 MXU inputs with f32 accumulation, so compare loosely.
    rows = (jnp.arange(32) * 16) // 32
    cols = (jnp.arange(32) * 16) // 32
    xf = x[:, :, rows, :][:, :, :, cols].reshape(2, IN_DIM)
    h1 = xf @ w1 + b1
    h1 = jnp.where(h1 > 0, h1, 0.2 * h1)
    h2 = h1 @ w2 + b2
    h2 = jnp.where(h2 > 0, h2, 0.2 * h2)
    mu_ref = h2 @ wmu + bmu
    std_ref = jnp.exp((h2 @ wlv + blv) * 0.5)
    assert jnp.allclose(mu, mu_ref, atol=3e-2, rtol=3e-2), \
        float(jnp.max(jnp.abs(mu - mu_ref)))
    assert jnp.allclose(std, std_ref, atol=3e-2, rtol=3e-2), \
        float(jnp.max(jnp.abs(std - std_ref)))

    print("KERNEL_OK")
</pallas_src>

<mosaic_0001>
module attributes {stable_mosaic.version = 11 : i64} {
  func.func @_encoder_kernel(%arg0: i32, %arg1: memref<16x256xbf16, #tpu.memory_space<vmem>>, %arg2: memref<256x256xbf16, #tpu.memory_space<vmem>>, %arg3: memref<1x256xf32, #tpu.memory_space<vmem>>, %arg4: memref<256x512xbf16, #tpu.memory_space<vmem>>, %arg5: memref<1x512xf32, #tpu.memory_space<vmem>>, %arg6: memref<512x128xbf16, #tpu.memory_space<vmem>>, %arg7: memref<1x128xf32, #tpu.memory_space<vmem>>, %arg8: memref<16x128xf32, #tpu.memory_space<vmem>>) attributes {dimension_semantics = [#tpu.dimension_semantics<parallel>], iteration_bounds = array<i64: 1>, scalar_prefetch = 0 : i64, scratch_operands = 0 : i64, tpu.core_type = #tpu.core_type<tc>, window_params = [{transform_indices = @transform_0, window_bounds = array<i64: 16, 256>}, {pipeline_mode = #tpu.pipeline_mode<synchronous>, transform_indices = @transform_1, window_bounds = array<i64: 256, 256>}, {pipeline_mode = #tpu.pipeline_mode<synchronous>, transform_indices = @transform_2, window_bounds = array<i64: 1, 256>}, {pipeline_mode = #tpu.pipeline_mode<synchronous>, transform_indices = @transform_3, window_bounds = array<i64: 256, 512>}, {pipeline_mode = #tpu.pipeline_mode<synchronous>, transform_indices = @transform_4, window_bounds = array<i64: 1, 512>}, {pipeline_mode = #tpu.pipeline_mode<synchronous>, transform_indices = @transform_5, window_bounds = array<i64: 512, 128>}, {pipeline_mode = #tpu.pipeline_mode<synchronous>, transform_indices = @transform_6, window_bounds = array<i64: 1, 128>}, {transform_indices = @transform_7, window_bounds = array<i64: 16, 128>}]} {
    %c0 = arith.constant 0 : index
    %c0_0 = arith.constant 0 : index
    %0 = vector.load %arg1[%c0, %c0_0] : memref<16x256xbf16, #tpu.memory_space<vmem>>, vector<16x256xbf16>
    %c0_1 = arith.constant 0 : index
    %c0_2 = arith.constant 0 : index
    %1 = vector.load %arg2[%c0_1, %c0_2] : memref<256x256xbf16, #tpu.memory_space<vmem>>, vector<256x256xbf16>
    %cst = arith.constant dense<0.000000e+00> : vector<16x256xf32>
    %2 = tpu.matmul %0, %1, %cst {dimension_numbers = #tpu.dot_dimension_numbers<[1], [0], [0], [1], [0, 0, 1, 1], [], []>} : vector<16x256xbf16>, vector<256x256xbf16>, vector<16x256xf32> -> vector<16x256xf32>
    %c0_3 = arith.constant 0 : index
    %c0_4 = arith.constant 0 : index
    %3 = vector.load %arg3[%c0_3, %c0_4] : memref<1x256xf32, #tpu.memory_space<vmem>>, vector<1x256xf32>
    %4 = vector.broadcast %3 : vector<1x256xf32> to vector<16x256xf32>
    %5 = arith.addf %2, %4 : vector<16x256xf32>
    %cst_5 = arith.constant 2.000000e-01 : f32
    %6 = vector.broadcast %cst_5 : f32 to vector<16x256xf32>
    %7 = arith.mulf %6, %5 : vector<16x256xf32>
    %8 = arith.maximumf %5, %7 : vector<16x256xf32>
    %9 = arith.truncf %8 : vector<16x256xf32> to vector<16x256xbf16>
    %c0_6 = arith.constant 0 : index
    %c0_7 = arith.constant 0 : index
    %10 = vector.load %arg4[%c0_6, %c0_7] : memref<256x512xbf16, #tpu.memory_space<vmem>>, vector<256x512xbf16>
    %cst_8 = arith.constant dense<0.000000e+00> : vector<16x512xf32>
    %11 = tpu.matmul %9, %10, %cst_8 {dimension_numbers = #tpu.dot_dimension_numbers<[1], [0], [0], [1], [0, 0, 1, 1], [], []>} : vector<16x256xbf16>, vector<256x512xbf16>, vector<16x512xf32> -> vector<16x512xf32>
    %c0_9 = arith.constant 0 : index
    %c0_10 = arith.constant 0 : index
    %12 = vector.load %arg5[%c0_9, %c0_10] : memref<1x512xf32, #tpu.memory_space<vmem>>, vector<1x512xf32>
    %13 = vector.broadcast %12 : vector<1x512xf32> to vector<16x512xf32>
    %14 = arith.addf %11, %13 : vector<16x512xf32>
    %cst_11 = arith.constant 2.000000e-01 : f32
    %15 = vector.broadcast %cst_11 : f32 to vector<16x512xf32>
    %16 = arith.mulf %15, %14 : vector<16x512xf32>
    %17 = arith.maximumf %14, %16 : vector<16x512xf32>
    %18 = arith.truncf %17 : vector<16x512xf32> to vector<16x512xbf16>
    %c0_12 = arith.constant 0 : index
    %c0_13 = arith.constant 0 : index
    %19 = vector.load %arg6[%c0_12, %c0_13] : memref<512x128xbf16, #tpu.memory_space<vmem>>, vector<512x128xbf16>
    %cst_14 = arith.constant dense<0.000000e+00> : vector<16x128xf32>
    %20 = tpu.matmul %18, %19, %cst_14 {dimension_numbers = #tpu.dot_dimension_numbers<[1], [0], [0], [1], [0, 0, 1, 1], [], []>} : vector<16x512xbf16>, vector<512x128xbf16>, vector<16x128xf32> -> vector<16x128xf32>
    %c0_15 = arith.constant 0 : index
    %c0_16 = arith.constant 0 : index
    %21 = vector.load %arg7[%c0_15, %c0_16] : memref<1x128xf32, #tpu.memory_space<vmem>>, vector<1x128xf32>
    %22 = vector.broadcast %21 : vector<1x128xf32> to vector<16x128xf32>
    %23 = arith.addf %20, %22 : vector<16x128xf32>
    %24 = tpu.iota {dimensions = array<i32: 1>} : vector<1x128xi32>
    %c64_i32 = arith.constant 64 : i32
    %25 = vector.broadcast %c64_i32 : i32 to vector<1x128xi32>
    %26 = arith.cmpi slt, %24, %25 : vector<1x128xi32>
    %cst_17 = arith.constant 0.000000e+00 : f32
    %27 = vector.shape_cast %26 : vector<1x128xi1> to vector<1x128xi1>
    %28 = vector.broadcast %27 : vector<1x128xi1> to vector<16x128xi1>
    %29 = vector.broadcast %cst_17 : f32 to vector<16x128xf32>
    %30 = arith.select %28, %29, %23 : vector<16x128xi1>, vector<16x128xf32>
    %cst_18 = arith.constant 5.000000e-01 : f32
    %31 = vector.broadcast %cst_18 : f32 to vector<16x128xf32>
    %32 = arith.mulf %30, %31 : vector<16x128xf32>
    %33 = math.exp %32 : vector<16x128xf32>
    %34 = vector.shape_cast %26 : vector<1x128xi1> to vector<1x128xi1>
    %35 = vector.broadcast %34 : vector<1x128xi1> to vector<16x128xi1>
    %36 = arith.select %35, %23, %33 : vector<16x128xi1>, vector<16x128xf32>
    %c0_19 = arith.constant 0 : index
    %c0_20 = arith.constant 0 : index
    %37 = vector.load %arg8[%c0_19, %c0_20] : memref<16x128xf32, #tpu.memory_space<vmem>>, vector<16x128xf32>
    tpu.vector_store %arg8[%c0_19, %c0_20], %36 {strides = array<i32>} : memref<16x128xf32, #tpu.memory_space<vmem>>, vector<16x128xf32>,
    return
  }
  func.func @transform_0(%arg0: i32) -> (i32, i32) {
    %c0_i32 = arith.constant 0 : i32
    %c0_i32_0 = arith.constant 0 : i32
    return %arg0, %c0_i32 : i32, i32
  }
  func.func @transform_1(%arg0: i32) -> (i32, i32) {
    %c0_i32 = arith.constant 0 : i32
    %c0_i32_0 = arith.constant 0 : i32
    %c0_i32_1 = arith.constant 0 : i32
    return %c0_i32, %c0_i32_0 : i32, i32
  }
  func.func @transform_2(%arg0: i32) -> (i32, i32) {
    %c0_i32 = arith.constant 0 : i32
    %c0_i32_0 = arith.constant 0 : i32
    %c0_i32_1 = arith.constant 0 : i32
    return %c0_i32, %c0_i32_0 : i32, i32
  }
  func.func @transform_3(%arg0: i32) -> (i32, i32) {
    %c0_i32 = arith.constant 0 : i32
    %c0_i32_0 = arith.constant 0 : i32
    %c0_i32_1 = arith.constant 0 : i32
    return %c0_i32, %c0_i32_0 : i32, i32
  }
  func.func @transform_4(%arg0: i32) -> (i32, i32) {
    %c0_i32 = arith.constant 0 : i32
    %c0_i32_0 = arith.constant 0 : i32
    %c0_i32_1 = arith.constant 0 : i32
    return %c0_i32, %c0_i32_0 : i32, i32
  }
  func.func @transform_5(%arg0: i32) -> (i32, i32) {
    %c0_i32 = arith.constant 0 : i32
    %c0_i32_0 = arith.constant 0 : i32
    %c0_i32_1 = arith.constant 0 : i32
    return %c0_i32, %c0_i32_0 : i32, i32
  }
  func.func @transform_6(%arg0: i32) -> (i32, i32) {
    %c0_i32 = arith.constant 0 : i32
    %c0_i32_0 = arith.constant 0 : i32
    %c0_i32_1 = arith.constant 0 : i32
    return %c0_i32, %c0_i32_0 : i32, i32
  }
  func.func @transform_7(%arg0: i32) -> (i32, i32) {
    %c0_i32 = arith.constant 0 : i32
    %c0_i32_0 = arith.constant 0 : i32
    return %arg0, %c0_i32 : i32, i32
  }
}

</mosaic_0001>

<bundles_post_ra>
// kernel: encoder_forward.1
= control target key start
LH: loop header
LB: loop body
LE: loop exit
PB: predicated region body
PF: predicated region fallthrough
CT: control target
= control target key end

     0   :  { %12 = vsyncpa [#allocation3], 0  ;;  %s1772_s0 = inlined_call_operand.vmem [shape: bf16[16,256], index: 0, kind: input, shape index: {}]   ;;  %s1773_s1 = inlined_call_operand.hbm [shape: bf16[256,256], index: 1, kind: input, shape index: {}]   ;;  %s1774_s2 = inlined_call_operand.vmem [shape: f32[1,256], index: 2, kind: input, shape index: {}]   ;;  %s1775_s3 = inlined_call_operand.hbm [shape: bf16[256,512], index: 3, kind: input, shape index: {}]   ;;  %s1776_s4 = inlined_call_operand.vmem [shape: f32[1,512], index: 4, kind: input, shape index: {}]   ;;  %s1777_s5 = inlined_call_operand.hbm [shape: bf16[512,128], index: 5, kind: input, shape index: {}]   ;;  %s1778_s6 = inlined_call_operand.vmem [shape: f32[1,128], index: 6, kind: input, shape index: {}]   ;;  %s1779_s7 = inlined_call_operand.vmem [shape: f32[16,128], index: 7, kind: output, shape index: {}]  }
   0x1   :  { %13 = vsyncpa [#allocation5], 0  ;;  %s1654_s24 = smov [#allocation4]   ;;  %s1584_s28 = scalar_lea.hbm %s1775_s3, 8192 }
   0x2   :  { %s35_s25 = sshll.u32 %s1654_s24, 4  ;;  %p1585_p0 = scmp.ne.s32.totalorder %s1775_s3, %s1584_s28  ;;  %s36_s25 = int_to_ptr.vmem [resolvable:$true] %s35_s25 }
   0x3   :  { %p1588_p1 = scmp.lt.u32.totalorder %s1584_s28, %s1775_s3 }
   0x5   :  { %p1590_p2 = pnand %p1588_p1, %p1585_p0 }
   0x7   :  { %1593 = shalt.err (!%p1590_p2)
}
   0x8   :  { %s1594_s10 = scalar_lea.vmem %s36_s25, 8192  ;;  %p1599_p4 = scmp.lt.s32.totalorder %s36_s25, %s36_s25 }
   0x9   :  { %p1595_p3 = scmp.ne.s32.totalorder %s36_s25, %s1594_s10  ;;  %p1600_p5 = scmp.lt.s32.totalorder %s1594_s10, %s1594_s10 }
   0xb   :  { %p1601_p6 = por %p1600_p5, %p1599_p4 }
   0xd   :  { %p1602_p7 = pnand %p1601_p6, %p1595_p3 }
   0xf   :  { %1605 = shalt.err (!%p1602_p7)
}
  0x10   :  { %s1655_s11 = smov 256   ;;  %s1656_s12 = smov 16  }
  0x11   :  { %41 = dma.hbm_to_vmem [thread:$0]  %s1775_s3, 8192, %s36_s25, [#allocation5], %s1655_s11, %s1655_s11, %s1656_s12  }
  0x12   :  { %s1657_s15 = smov [#allocation2]   ;;  %s1606_s19 = scalar_lea.hbm %s1773_s1, 4096 }
  0x13   :  { %s21_s16 = sshll.u32 %s1657_s15, 4  ;;  %p1607_p8 = scmp.ne.s32.totalorder %s1773_s1, %s1606_s19  ;;  %s22_s16 = int_to_ptr.vmem [resolvable:$true] %s21_s16 }
  0x14   :  { %p1610_p9 = scmp.lt.u32.totalorder %s1606_s19, %s1773_s1 }
  0x16   :  { %p1612_p10 = pnand %p1610_p9, %p1607_p8 }
  0x18   :  { %1615 = shalt.err (!%p1612_p10)
}
  0x19   :  { %s1616_s24 = scalar_lea.vmem %s22_s16, 4096  ;;  %p1621_p12 = scmp.lt.s32.totalorder %s22_s16, %s22_s16 }
  0x1a   :  { %p1617_p11 = scmp.ne.s32.totalorder %s22_s16, %s1616_s24  ;;  %p1622_p13 = scmp.lt.s32.totalorder %s1616_s24, %s1616_s24 }
  0x1c   :  { %p1623_p0 = por %p1622_p13, %p1621_p12 }
  0x1e   :  { %p1624_p1 = pnand %p1623_p0, %p1617_p11 }
  0x20   :  { %1627 = shalt.err (!%p1624_p1)
}
  0x21   :  { %s1658_s3 = smov 128   ;;  %s1659_s25 = smov 8  }
  0x22   :  { %27 = dma.hbm_to_vmem [thread:$0]  %s1773_s1, 4096, %s22_s16, [#allocation3], %s1658_s3, %s1658_s3, %s1659_s25  }
  0x23   :  { %s1660_s28 = smov [#allocation6]   ;;  %s1628_s9 = scalar_lea.hbm %s1777_s5, 4096 }
  0x24   :  { %s49_s29 = sshll.u32 %s1660_s28, 4  ;;  %p1629_p2 = scmp.ne.s32.totalorder %s1777_s5, %s1628_s9  ;;  %s50_s29 = int_to_ptr.vmem [resolvable:$true] %s49_s29 }
  0x25   :  { %p1632_p3 = scmp.lt.u32.totalorder %s1628_s9, %s1777_s5 }
  0x27   :  { %p1634_p4 = pnand %p1632_p3, %p1629_p2 }
  0x29   :  { %1637 = shalt.err (!%p1634_p4)
}
  0x2a   :  { %s1638_s14 = scalar_lea.vmem %s50_s29, 4096  ;;  %p1643_p6 = scmp.lt.s32.totalorder %s50_s29, %s50_s29 }
  0x2b   :  { %p1639_p5 = scmp.ne.s32.totalorder %s50_s29, %s1638_s14  ;;  %p1644_p7 = scmp.lt.s32.totalorder %s1638_s14, %s1638_s14 }
  0x2d   :  { %p1645_p8 = por %p1644_p7, %p1643_p6 }
  0x2f   :  { %p1646_p9 = pnand %p1645_p8, %p1639_p5 }
  0x31   :  { %1649 = shalt.err (!%p1646_p9)
}
  0x32   :  { %s1661_s1 = smov 64   ;;  %s1662_s15 = smov 4  }
  0x33   :  { %55 = dma.hbm_to_vmem [thread:$0]  %s1777_s5, 4096, %s50_s29, [#allocation5], %s1661_s1, %s1661_s1, %s1662_s15  }
  0x34   :  { %1650 = dma.done.wait [#allocation3], 4096  }
  0x35   :  { %1651 = vsyncadd [#allocation3], 4294963200 }
  0x36   :  { %1652 = dma.done.wait [#allocation5], 12288  }
  0x37   :  { %1653 = vsyncadd [#allocation5], 4294955008  ;;  %v1401_v0 = vld [vmem:[#allocation2 + $0x4] ss:$8 sps:$4 sm:$0xff]   ;;  %v1403_v1 = vld [vmem:[#allocation2] ss:$8 sps:$4 sm:$0xff]  }
  0x38   :  { %284 = vmatprep.subr.bf16.mxu0 %v1401_v0  ;;  %v1404_v2 = vld [vmem:[#allocation2 + $0x14] ss:$8 sps:$4 sm:$0xff]   ;;  %v1406_v3 = vld [vmem:[#allocation2 + $0x10] ss:$8 sps:$4 sm:$0xff]   ;;  %v1407_v4 = vld [vmem:[#allocation2 + $0x24] ss:$8 sps:$4 sm:$0xff]  }
  0x39   :  { %285 = vmatpush1.bf16.msra.mxu0 %v1403_v1  ;;  %v1409_v5 = vld [vmem:[#allocation2 + $0x20] ss:$8 sps:$4 sm:$0xff]   ;;  %v1410_v6 = vld [vmem:[#allocation2 + $0x34] ss:$8 sps:$4 sm:$0xff]   ;;  %v1412_v7 = vld [vmem:[#allocation2 + $0x30] ss:$8 sps:$4 sm:$0xff]  }
  0x3a   :  { %286 = vmatprep.subr.bf16.mxu0 %v1404_v2  ;;  %v1413_v8 = vld [vmem:[#allocation2 + $0x44] ss:$8 sps:$4 sm:$0xff]   ;;  %v1415_v9 = vld [vmem:[#allocation2 + $0x40] ss:$8 sps:$4 sm:$0xff]   ;;  %v1416_v10 = vld [vmem:[#allocation2 + $0x54] ss:$8 sps:$4 sm:$0xff]  }
  0x3b   :  { %v1418_v11 = vld [vmem:[#allocation2 + $0x50] ss:$8 sps:$4 sm:$0xff]   ;;  %v1419_v12 = vld [vmem:[#allocation2 + $0x64] ss:$8 sps:$4 sm:$0xff]   ;;  %v1421_v13 = vld [vmem:[#allocation2 + $0x60] ss:$8 sps:$4 sm:$0xff]  }
  0x3c   :  { %v1451_v14 = vld [vmem:[%s1772_s0 + $0x4] ss:$8 sps:$4 sm:$0xff]   ;;  %v1422_v16 = vld [vmem:[#allocation2 + $0x74] ss:$8 sps:$4 sm:$0xff]   ;;  %v1457_v17 = vld [vmem:[#allocation4] ss:$16 sps:$4 sm:$0xff]  }
  0x3d   :  { %287 = vmatpush1.bf16.msra.mxu0 %v1406_v3  ;;  %v1452_v15 = vld [vmem:[#allocation4 + $0x4] ss:$16 sps:$4 sm:$0xff]   ;;  %316 = vmatprep.mubr.bf16.mxu0 %v1451_v14  ;;  %v1424_v19 = vld [vmem:[#allocation2 + $0x70] ss:$8 sps:$4 sm:$0xff]   ;;  %v1427_v23 = vld [vmem:[#allocation2 + $0x80] ss:$8 sps:$4 sm:$0xff]  }
  0x3e   :  { %288 = vmatprep.subr.bf16.mxu0 %v1407_v4  ;;  %743 = vmatprep.subr.bf16.mxu1 %v1452_v15  ;;  %v1458_v18 = vld [vmem:[#allocation4 + $0x24] ss:$16 sps:$4 sm:$0xff]   ;;  %v1463_v21 = vld [vmem:[#allocation4 + $0x20] ss:$16 sps:$4 sm:$0xff]   ;;  %v1456_v53 = vld [vmem:[#allocation4 + $0xc] ss:$16 sps:$4 sm:$0xff]  }
  0x3f   :  { %v1425_v20 = vld [vmem:[#allocation2 + $0x84] ss:$8 sps:$4 sm:$0xff]   ;;  %744 = vmatpush1.bf16.msra.mxu1 %v1457_v17  ;;  %v1469_v24 = vld [vmem:[#allocation4 + $0x40] ss:$16 sps:$4 sm:$0xff]   ;;  %v1428_v25 = vld [vmem:[#allocation2 + $0x94] ss:$8 sps:$4 sm:$0xff]  }
  0x40   :  { %745 = vmatprep.subr.bf16.mxu1 %v1458_v18  ;;  %v1464_v22 = vld [vmem:[#allocation4 + $0x44] ss:$16 sps:$4 sm:$0xff]   ;;  %v1430_v27 = vld [vmem:[#allocation2 + $0x90] ss:$8 sps:$4 sm:$0xff]   ;;  %v1433_v31 = vld [vmem:[#allocation2 + $0xa0] ss:$8 sps:$4 sm:$0xff]  }
  0x41   :  { %289 = vmatpush1.bf16.msra.mxu0 %v1409_v5  ;;  %v1470_v26 = vld [vmem:[#allocation4 + $0x64] ss:$16 sps:$4 sm:$0xff]   ;;  %v1475_v29 = vld [vmem:[#allocation4 + $0x60] ss:$16 sps:$4 sm:$0xff]   ;;  %v1454_v56 = vld [vmem:[#allocation4 + $0x8] ss:$16 sps:$4 sm:$0xff]  }
  0x42   :  { %290 = vmatprep.subr.bf16.mxu0 %v1410_v6  ;;  %v1431_v28 = vld [vmem:[#allocation2 + $0xa4] ss:$8 sps:$4 sm:$0xff]   ;;  %v1481_v32 = vld [vmem:[#allocation4 + $0x80] ss:$16 sps:$4 sm:$0xff]   ;;  %v1434_v33 = vld [vmem:[#allocation2 + $0xb4] ss:$8 sps:$4 sm:$0xff]  }
  0x43   :  { %746 = vmatpush1.bf16.msra.mxu1 %v1463_v21  ;;  %v1476_v30 = vld [vmem:[#allocation4 + $0x84] ss:$16 sps:$4 sm:$0xff]   ;;  %v1436_v35 = vld [vmem:[#allocation2 + $0xb0] ss:$8 sps:$4 sm:$0xff]   ;;  %v1439_v39 = vld [vmem:[#allocation2 + $0xc0] ss:$8 sps:$4 sm:$0xff]  }
  0x44   :  { %747 = vmatprep.subr.bf16.mxu1 %v1464_v22  ;;  %v1482_v34 = vld [vmem:[#allocation4 + $0xa4] ss:$16 sps:$4 sm:$0xff]   ;;  %v1487_v37 = vld [vmem:[#allocation4 + $0xa0] ss:$16 sps:$4 sm:$0xff]   ;;  %v1462_v58 = vld [vmem:[#allocation4 + $0x2c] ss:$16 sps:$4 sm:$0xff]  }
  0x45   :  { %291 = vmatpush1.bf16.msra.mxu0 %v1412_v7  ;;  %v1437_v36 = vld [vmem:[#allocation2 + $0xc4] ss:$8 sps:$4 sm:$0xff]   ;;  %v1493_v40 = vld [vmem:[#allocation4 + $0xc0] ss:$16 sps:$4 sm:$0xff]   ;;  %v1440_v41 = vld [vmem:[#allocation2 + $0xd4] ss:$8 sps:$4 sm:$0xff]  }
  0x46   :  { %292 = vmatprep.subr.bf16.mxu0 %v1413_v8  ;;  %v1488_v38 = vld [vmem:[#allocation4 + $0xc4] ss:$16 sps:$4 sm:$0xff]   ;;  %v1442_v43 = vld [vmem:[#allocation2 + $0xd0] ss:$8 sps:$4 sm:$0xff]   ;;  %v1445_v47 = vld [vmem:[#allocation2 + $0xe0] ss:$8 sps:$4 sm:$0xff]  }
  0x47   :  { %748 = vmatpush1.bf16.msra.mxu1 %v1469_v24  ;;  %v1494_v42 = vld [vmem:[#allocation4 + $0xe4] ss:$16 sps:$4 sm:$0xff]   ;;  %v1499_v45 = vld [vmem:[#allocation4 + $0xe0] ss:$16 sps:$4 sm:$0xff]   ;;  %v1460_v60 = vld [vmem:[#allocation4 + $0x28] ss:$16 sps:$4 sm:$0xff]  }
  0x48   :  { %749 = vmatprep.subr.bf16.mxu1 %v1470_v26  ;;  %v1443_v44 = vld [vmem:[#allocation2 + $0xe4] ss:$8 sps:$4 sm:$0xff]   ;;  %v1505_v48 = vld [vmem:[#allocation4 + $0x100] ss:$16 sps:$4 sm:$0xff]   ;;  %v1446_v49 = vld [vmem:[#allocation2 + $0xf4] ss:$8 sps:$4 sm:$0xff]  }
  0x49   :  { %293 = vmatpush1.bf16.msra.mxu0 %v1415_v9  ;;  %v1500_v46 = vld [vmem:[#allocation4 + $0x104] ss:$16 sps:$4 sm:$0xff]   ;;  %v1448_v51 = vld [vmem:[#allocation2 + $0xf0] ss:$8 sps:$4 sm:$0xff]   ;;  %v1449_v55 = vld [vmem:[%s1772_s0] ss:$8 sps:$4 sm:$0xff]  }
  0x4a   :  { %294 = vmatprep.subr.bf16.mxu0 %v1416_v10  ;;  %v1506_v50 = vld [vmem:[#allocation4 + $0x124] ss:$16 sps:$4 sm:$0xff]   ;;  %v1511_v52 = vld [vmem:[#allocation4 + $0x120] ss:$16 sps:$4 sm:$0xff]   ;;  %v1468_v62 = vld [vmem:[#allocation4 + $0x4c] ss:$16 sps:$4 sm:$0xff]  }
  0x4b   :  { %750 = vmatpush1.bf16.msra.mxu1 %v1475_v29  ;;  %v1512_v54 = vld [vmem:[#allocation4 + $0x144] ss:$16 sps:$4 sm:$0xff]   ;;  %v1517_v57 = vld [vmem:[#allocation4 + $0x140] ss:$16 sps:$4 sm:$0xff]   ;;  %v1466_v0 = vld [vmem:[#allocation4 + $0x48] ss:$16 sps:$4 sm:$0xff]  }
  0x4c   :  { %751 = vmatprep.subr.bf16.mxu1 %v1476_v30  ;;  %v1518_v59 = vld [vmem:[#allocation4 + $0x164] ss:$16 sps:$4 sm:$0xff]   ;;  %v1523_v61 = vld [vmem:[#allocation4 + $0x160] ss:$16 sps:$4 sm:$0xff]   ;;  %v1474_v2 = vld [vmem:[#allocation4 + $0x6c] ss:$16 sps:$4 sm:$0xff]  }
  0x4d   :  { %295 = vmatpush1.bf16.msra.mxu0 %v1418_v11  ;;  %v1524_v63 = vld [vmem:[#allocation4 + $0x184] ss:$16 sps:$4 sm:$0xff]   ;;  %v1529_v1 = vld [vmem:[#allocation4 + $0x180] ss:$16 sps:$4 sm:$0xff]   ;;  %v1472_v3 = vld [vmem:[#allocation4 + $0x68] ss:$16 sps:$4 sm:$0xff]  }
  0x4e   :  { %296 = vmatprep.subr.bf16.mxu0 %v1419_v12  ;;  %v1480_v4 = vld [vmem:[#allocation4 + $0x8c] ss:$16 sps:$4 sm:$0xff]   ;;  %v1478_v5 = vld [vmem:[#allocation4 + $0x88] ss:$16 sps:$4 sm:$0xff]   ;;  %v1530_v22 = vld [vmem:[#allocation4 + $0x1a4] ss:$16 sps:$4 sm:$0xff]  }
  0x4f   :  { %752 = vmatpush1.bf16.msra.mxu1 %v1481_v32  ;;  %v1486_v6 = vld [vmem:[#allocation4 + $0xac] ss:$16 sps:$4 sm:$0xff]   ;;  %v1484_v7 = vld [vmem:[#allocation4 + $0xa8] ss:$16 sps:$4 sm:$0xff]   ;;  %v1536_v26 = vld [vmem:[#allocation4 + $0x1c4] ss:$16 sps:$4 sm:$0xff]  }
  0x50   :  { %753 = vmatprep.subr.bf16.mxu1 %v1482_v34  ;;  %v1492_v8 = vld [vmem:[#allocation4 + $0xcc] ss:$16 sps:$4 sm:$0xff]   ;;  %v1490_v9 = vld [vmem:[#allocation4 + $0xc8] ss:$16 sps:$4 sm:$0xff]   ;;  %v1541_v29 = vld [vmem:[#allocation4 + $0x1c0] ss:$16 sps:$4 sm:$0xff]  }
  0x51   :  { %297 = vmatpush1.bf16.msra.mxu0 %v1421_v13  ;;  %v1498_v10 = vld [vmem:[#allocation4 + $0xec] ss:$16 sps:$4 sm:$0xff]   ;;  %v1496_v11 = vld [vmem:[#allocation4 + $0xe8] ss:$16 sps:$4 sm:$0xff]   ;;  %v1542_v30 = vld [vmem:[#allocation4 + $0x1e4] ss:$16 sps:$4 sm:$0xff]  }
  0x52   :  { %298 = vmatprep.subr.bf16.mxu0 %v1422_v16  ;;  %v1504_v12 = vld [vmem:[#allocation4 + $0x10c] ss:$16 sps:$4 sm:$0xff]   ;;  %v1502_v13 = vld [vmem:[#allocation4 + $0x108] ss:$16 sps:$4 sm:$0xff]   ;;  %v1548_v34 = vld [vmem:[#allocation6 + $0x40] sm:$0xff]  }
  0x53   :  { %754 = vmatpush1.bf16.msra.mxu1 %v1487_v37  ;;  %v1510_v14 = vld [vmem:[#allocation4 + $0x12c] ss:$16 sps:$4 sm:$0xff]   ;;  %v1508_v15 = vld [vmem:[#allocation4 + $0x128] ss:$16 sps:$4 sm:$0xff]  }
  0x54   :  { %755 = vmatprep.subr.bf16.mxu1 %v1488_v38  ;;  %v1516_v16 = vld [vmem:[#allocation4 + $0x14c] ss:$16 sps:$4 sm:$0xff]   ;;  %v1514_v17 = vld [vmem:[#allocation4 + $0x148] ss:$16 sps:$4 sm:$0xff]   ;;  %v102_v38 = vld [vmem:[%s1774_s2] sm:$0x3] }
  0x55   :  { %299 = vmatpush1.bf16.msra.mxu0 %v1424_v19  ;;  %v1522_v18 = vld [vmem:[#allocation4 + $0x16c] ss:$16 sps:$4 sm:$0xff]   ;;  %v1520_v19 = vld [vmem:[#allocation4 + $0x168] ss:$16 sps:$4 sm:$0xff]  }
  0x56   :  { %300 = vmatprep.subr.bf16.mxu0 %v1425_v20  ;;  %v1528_v20 = vld [vmem:[#allocation4 + $0x18c] ss:$16 sps:$4 sm:$0xff]   ;;  %v1526_v21 = vld [vmem:[#allocation4 + $0x188] ss:$16 sps:$4 sm:$0xff]  }
  0x57   :  { %756 = vmatpush1.bf16.msra.mxu1 %v1493_v40  ;;  %v1532_v24 = vld [vmem:[#allocation4 + $0x1a8] ss:$16 sps:$4 sm:$0xff]  }
  0x58   :  { %757 = vmatprep.subr.bf16.mxu1 %v1494_v42  ;;  %v1544_v32 = vld [vmem:[#allocation4 + $0x1e8] ss:$16 sps:$4 sm:$0xff]  }
  0x59   :  { %301 = vmatpush1.bf16.msra.mxu0 %v1427_v23  ;;  %v1534_v23 = vld [vmem:[#allocation4 + $0x1ac] ss:$16 sps:$4 sm:$0xff]  }
  0x5a   :  { %302 = vmatprep.subr.bf16.mxu0 %v1428_v25  ;;  %v1535_v25 = vld [vmem:[#allocation4 + $0x1a0] ss:$16 sps:$4 sm:$0xff]  }
  0x5b   :  { %758 = vmatpush1.bf16.msra.mxu1 %v1499_v45 }
  0x5c   :  { %759 = vmatprep.subr.bf16.mxu1 %v1500_v46 }
  0x5d   :  { %303 = vmatpush1.bf16.msra.mxu0 %v1430_v27  ;;  %v1540_v27 = vld [vmem:[#allocation4 + $0x1cc] ss:$16 sps:$4 sm:$0xff]  }
  0x5e   :  { %304 = vmatprep.subr.bf16.mxu0 %v1431_v28  ;;  %v1538_v28 = vld [vmem:[#allocation4 + $0x1c8] ss:$16 sps:$4 sm:$0xff]  }
  0x5f   :  { %760 = vmatpush1.bf16.msra.mxu1 %v1505_v48 }
  0x60   :  { %761 = vmatprep.subr.bf16.mxu1 %v1506_v50 }
  0x61   :  { %305 = vmatpush1.bf16.msra.mxu0 %v1433_v31  ;;  %v1546_v31 = vld [vmem:[#allocation4 + $0x1ec] ss:$16 sps:$4 sm:$0xff]  }
  0x62   :  { %306 = vmatprep.subr.bf16.mxu0 %v1434_v33  ;;  %v1547_v33 = vld [vmem:[#allocation4 + $0x1e0] ss:$16 sps:$4 sm:$0xff]  }
  0x63   :  { %762 = vmatpush1.bf16.msra.mxu1 %v1511_v52 }
  0x64   :  { %763 = vmatprep.subr.bf16.mxu1 %v1512_v54 }
  0x65   :  { %307 = vmatpush1.bf16.msra.mxu0 %v1436_v35  ;;  %v104_v35 = vlaneseq }
  0x66   :  { %308 = vmatprep.subr.bf16.mxu0 %v1437_v36 }
  0x67   :  { %764 = vmatpush1.bf16.msra.mxu1 %v1517_v57  ;;  %v1746_v36 = vshrl.u32 %v104_v35, 7 }
  0x68   :  { %765 = vmatprep.subr.bf16.mxu1 %v1518_v59 }
  0x69   :  { %309 = vmatpush1.bf16.msra.mxu0 %v1439_v39  ;;  %v106_v37 = vsub.s32 0, %v1746_v36  ;;  %v110_v39 = vsub.s32 1, %v1746_v36 }
  0x6a   :  { %310 = vmatprep.subr.bf16.mxu0 %v1440_v41 }
  0x6b   :  { %766 = vmatpush1.bf16.msra.mxu1 %v1523_v61  ;;  %v107_v40 = vrot.slane %v102_v38, %v106_v37  ;;  %v111_v41 = vrot.slane %v102_v38, %v110_v39  ;;  %v1550_v61 = vld [vmem:[#allocation6 + $0x48] sm:$0xff]  }
  0x6c   :  { %767 = vmatprep.subr.bf16.mxu1 %v1524_v63  ;;  %v1552_v63 = vld [vmem:[#allocation6 + $0x50] sm:$0xff]  }
  0x6d   :  { %311 = vmatpush1.bf16.msra.mxu0 %v1442_v43 }
  0x6e   :  { %312 = vmatprep.subr.bf16.mxu0 %v1443_v44 }
  0x6f   :  { %768 = vmatpush1.bf16.msra.mxu1 %v1529_v1  ;;  %v1554_v1 = vld [vmem:[#allocation6 + $0x58] sm:$0xff]  }
  0x70   :  { %769 = vmatprep.subr.bf16.mxu1 %v1530_v22 }
  0x71   :  { %313 = vmatpush1.bf16.msra.mxu0 %v1445_v47 }
  0x72   :  { %314 = vmatprep.subr.bf16.mxu0 %v1446_v49 }
  0x73   :  { %770 = vmatpush1.bf16.msra.mxu1 %v1535_v25 }
  0x74   :  { %771 = vmatprep.subr.bf16.mxu1 %v1536_v26 }
  0x75   :  { %315 = vmatpush1.bf16.msra.mxu0 %v1448_v51 }
  0x76   :  { %786 = vmatprep.subr.bf16.mxu0 %v1456_v53 }
  0x77   :  { %772 = vmatpush1.bf16.msra.mxu1 %v1541_v29 }
  0x78   :  { %317 = vmatmul.mubr.bf16.vlgmr.msra.gmra.mrb[0].mxu0 %v1449_v55  ;;  %773 = vmatprep.subr.bf16.mxu1 %v1542_v30 }
  0x79   :  { %787 = vmatpush1.bf16.msra.mxu0 %v1454_v56 }
  0x7a   :  { %788 = vmatprep.subr.bf16.mxu0 %v1462_v58 }
  0x7b   :  { %774 = vmatpush1.bf16.msra.mxu1 %v1547_v33 }
  0x7c   :  { %1348 = vmatprep.subr.bf16.mxu1 %v1548_v34 }
  0x7d   :  { %789 = vmatpush1.bf16.msra.mxu0 %v1460_v60  ;;  %v1549_v60 = vld [vmem:[#allocation6] sm:$0xff]  }
  0x7e   :  { %790 = vmatprep.subr.bf16.mxu0 %v1468_v62  ;;  %v1551_v62 = vld [vmem:[#allocation6 + $0x8] sm:$0xff]  }
  0x81   :  { %791 = vmatpush1.bf16.msra.mxu0 %v1466_v0  ;;  %v1553_v0 = vld [vmem:[#allocation6 + $0x10] sm:$0xff]  }
  0x82   :  { %792 = vmatprep.subr.bf16.mxu0 %v1474_v2  ;;  %v1555_v2 = vld [vmem:[#allocation6 + $0x18] sm:$0xff]  }
  0x85   :  { %793 = vmatpush1.bf16.msra.mxu0 %v1472_v3  ;;  %v1556_v3 = vld [vmem:[#allocation6 + $0x60] sm:$0xff]  }
  0x86   :  { %794 = vmatprep.subr.bf16.mxu0 %v1480_v4  ;;  %v1557_v4 = vld [vmem:[#allocation6 + $0x20] sm:$0xff]  }
  0x89   :  { %795 = vmatpush1.bf16.msra.mxu0 %v1478_v5  ;;  %v1558_v5 = vld [vmem:[#allocation6 + $0x68] sm:$0xff]  }
  0x8a   :  { %796 = vmatprep.subr.bf16.mxu0 %v1486_v6  ;;  %v1559_v6 = vld [vmem:[#allocation6 + $0x28] sm:$0xff]  }
  0x8d   :  { %797 = vmatpush1.bf16.msra.mxu0 %v1484_v7  ;;  %v1560_v7 = vld [vmem:[#allocation6 + $0x70] sm:$0xff]  }
  0x8e   :  { %798 = vmatprep.subr.bf16.mxu0 %v1492_v8  ;;  %v1561_v8 = vld [vmem:[#allocation6 + $0x30] sm:$0xff]  }
  0x91   :  { %799 = vmatpush1.bf16.msra.mxu0 %v1490_v9  ;;  %v1562_v9 = vld [vmem:[#allocation6 + $0x78] sm:$0xff]  }
  0x92   :  { %800 = vmatprep.subr.bf16.mxu0 %v1498_v10  ;;  %v1563_v10 = vld [vmem:[#allocation6 + $0x38] sm:$0xff]  }
  0x95   :  { %801 = vmatpush1.bf16.msra.mxu0 %v1496_v11  ;;  %v1564_v11 = vld [vmem:[#allocation6 + $0xc0] sm:$0xff]  }
  0x96   :  { %802 = vmatprep.subr.bf16.mxu0 %v1504_v12  ;;  %v413_v12 = vsub.s32 2, %v1746_v36 }
  0x99   :  { %803 = vmatpush1.bf16.msra.mxu0 %v1502_v13  ;;  %v401_v13 = vld [vmem:[%s1776_s4] sm:$0xf] }
  0x9a   :  { %804 = vmatprep.subr.bf16.mxu0 %v1510_v14  ;;  %v417_v14 = vsub.s32 3, %v1746_v36 }
  0x9d   :  { %805 = vmatpush1.bf16.msra.mxu0 %v1508_v15  ;;  %v406_v15 = vrot.slane %v401_v13, %v106_v37 }
  0x9e   :  { %806 = vmatprep.subr.bf16.mxu0 %v1516_v16  ;;  %v414_v16 = vrot.slane %v401_v13, %v413_v12 }
  0xa1   :  { %807 = vmatpush1.bf16.msra.mxu0 %v1514_v17  ;;  %v410_v17 = vrot.slane %v401_v13, %v110_v39 }
  0xa2   :  { %808 = vmatprep.subr.bf16.mxu0 %v1522_v18  ;;  %v418_v18 = vrot.slane %v401_v13, %v417_v14  ;;  %v1315_v13 = vld [vmem:[%s1778_s6] ss:$0 sm:$0xff]  ;;  %v1195_v14 = vand.u32 127, %v104_v35 }
  0xa4   :  { %vm1196_vm0 = vcmp.lt.s32.totalorder %v1195_v14, 64 }
  0xa5   :  { %809 = vmatpush1.bf16.msra.mxu0 %v1520_v19 }
  0xa6   :  { %810 = vmatprep.subr.bf16.mxu0 %v1528_v20 }
  0xa9   :  { %811 = vmatpush1.bf16.msra.mxu0 %v1526_v21 }
  0xaa   :  { %812 = vmatprep.subr.bf16.mxu0 %v1534_v23 }
  0xad   :  { %813 = vmatpush1.bf16.msra.mxu0 %v1532_v24 }
  0xae   :  { %814 = vmatprep.subr.bf16.mxu0 %v1540_v27 }
  0xb1   :  { %815 = vmatpush1.bf16.msra.mxu0 %v1538_v28 }
  0xb2   :  { %816 = vmatprep.subr.bf16.mxu0 %v1546_v31 }
  0xb5   :  { %817 = vmatpush1.bf16.msra.mxu0 %v1544_v32 }
 0x14b   :  { %v318_v42 = vpop.f32.mrb[0].mxu0 }
 0x14c   :  { %v319_v43 = vadd.f32 %v318_v42, %v107_v40  ;;  %v320_v44 = vpop.f32.mrb[1].mxu0 }
 0x14d   :  { %v321_v45 = vadd.f32 %v320_v44, %v111_v41  ;;  %v322_v46 = vpop.f32.mrb[2].mxu0 }
 0x14e   :  { %v327_v47 = vmul.f32 0.2, %v319_v43  ;;  %v323_v48 = vadd.f32 %v322_v46, %v107_v40  ;;  %v324_v49 = vpop.f32.mrb[3].mxu0 }
 0x14f   :  { %v328_v50 = vmul.f32 0.2, %v321_v45  ;;  %v325_v51 = vadd.f32 %v324_v49, %v111_v41 }
 0x150   :  { %v329_v52 = vmul.f32 0.2, %v323_v48  ;;  %v331_v54 = vmax.f32 %v319_v43, %v327_v47 }
 0x151   :  { %v330_v53 = vmul.f32 0.2, %v325_v51  ;;  %v332_v56 = vmax.f32 %v321_v45, %v328_v50 }
 0x152   :  { %v333_v55 = vmax.f32 %v323_v48, %v329_v52 }
 0x153   :  { %v334_v57 = vmax.f32 %v325_v51, %v330_v53 }
 0x154   :  { %v335_v58 = vpack.c.bf16 %v333_v55, %v331_v54  ;;  %v1565_v55 = vld [vmem:[#allocation6 + $0x80] sm:$0xff]  }
 0x155   :  { %v336_v59 = vpack.c.bf16 %v334_v57, %v332_v56  ;;  %v1566_v57 = vld [vmem:[#allocation6 + $0xc8] sm:$0xff]  }
 0x157   :  { %775 = vmatprep.mubr.bf16.mxu1 %v336_v59  ;;  %818 = vmatprep.mubr.bf16.mxu0 %v336_v59  ;;  %v1568_v59 = vld [vmem:[#allocation6 + $0xd0] sm:$0xff]  }
 0x158   :  { %776 = vmatmul.mubr.bf16.vlgmr.msra.gmra.mrb[0].mxu1 %v335_v58  ;;  %819 = vmatmul.mubr.bf16.vlgmr.msra.gmra.mrb[4].mxu0 %v335_v58  ;;  %v1567_v58 = vld [vmem:[#allocation6 + $0x88] sm:$0xff]  }
 0x159   :  { %1349 = vmatpush3.bf16.msra.mxu1 %v1549_v60  ;;  %v1569_v60 = vld [vmem:[#allocation6 + $0x90] sm:$0xff]  }
 0x15a   :  { %1350 = vmatprep.subr.bf16.mxu1 %v1550_v61  ;;  %v1570_v61 = vld [vmem:[#allocation6 + $0xd8] sm:$0xff]  }
 0x15d   :  { %1351 = vmatpush3.bf16.msra.mxu1 %v1551_v62  ;;  %v1571_v62 = vld [vmem:[#allocation6 + $0x98] sm:$0xff]  }
 0x15e   :  { %1352 = vmatprep.subr.bf16.mxu1 %v1552_v63  ;;  %v1572_v63 = vld [vmem:[#allocation6 + $0xe0] sm:$0xff]  }
 0x161   :  { %1353 = vmatpush3.bf16.msra.mxu1 %v1553_v0  ;;  %v1573_v0 = vld [vmem:[#allocation6 + $0xa0] sm:$0xff]  }
 0x162   :  { %1354 = vmatprep.subr.bf16.mxu1 %v1554_v1  ;;  %v1574_v1 = vld [vmem:[#allocation6 + $0xe8] sm:$0xff]  }
 0x165   :  { %1355 = vmatpush3.bf16.msra.mxu1 %v1555_v2  ;;  %v1575_v2 = vld [vmem:[#allocation6 + $0xa8] sm:$0xff]  }
 0x166   :  { %1356 = vmatprep.subr.bf16.mxu1 %v1556_v3  ;;  %v1576_v3 = vld [vmem:[#allocation6 + $0xf0] sm:$0xff]  }
 0x169   :  { %1357 = vmatpush3.bf16.msra.mxu1 %v1557_v4  ;;  %v1577_v4 = vld [vmem:[#allocation6 + $0xb0] sm:$0xff]  }
 0x16a   :  { %1358 = vmatprep.subr.bf16.mxu1 %v1558_v5  ;;  %v1578_v5 = vld [vmem:[#allocation6 + $0xf8] sm:$0xff]  }
 0x16d   :  { %1359 = vmatpush3.bf16.msra.mxu1 %v1559_v6  ;;  %v1579_v6 = vld [vmem:[#allocation6 + $0xb8] sm:$0xff]  }
 0x16e   :  { %1360 = vmatprep.subr.bf16.mxu1 %v1560_v7 }
 0x171   :  { %1361 = vmatpush3.bf16.msra.mxu1 %v1561_v8 }
 0x172   :  { %1362 = vmatprep.subr.bf16.mxu1 %v1562_v9 }
 0x175   :  { %1363 = vmatpush3.bf16.msra.mxu1 %v1563_v10 }
 0x176   :  { %1370 = vmatprep.subr.bf16.mxu1 %v1564_v11 }
 0x22b   :  { %v777_v19 = vpop.f32.mrb[0].mxu1  ;;  %v820_v20 = vpop.f32.mrb[4].mxu0 }
 0x22c   :  { %v778_v21 = vadd.f32 %v777_v19, %v406_v15  ;;  %v821_v22 = vadd.f32 %v820_v20, %v414_v16  ;;  %v779_v23 = vpop.f32.mrb[1].mxu1  ;;  %v822_v24 = vpop.f32.mrb[5].mxu0 }
 0x22d   :  { %v780_v25 = vadd.f32 %v779_v23, %v410_v17  ;;  %v823_v26 = vadd.f32 %v822_v24, %v418_v18  ;;  %v781_v27 = vpop.f32.mrb[2].mxu1  ;;  %v824_v28 = vpop.f32.mrb[6].mxu0 }
 0x22e   :  { %v829_v29 = vmul.f32 0.2, %v778_v21  ;;  %v831_v30 = vmul.f32 0.2, %v821_v22  ;;  %v782_v31 = vadd.f32 %v781_v27, %v406_v15  ;;  %v825_v32 = vadd.f32 %v824_v28, %v414_v16  ;;  %v783_v33 = vpop.f32.mrb[3].mxu1  ;;  %v826_v34 = vpop.f32.mrb[7].mxu0 }
 0x22f   :  { %v830_v36 = vmul.f32 0.2, %v780_v25  ;;  %v832_v37 = vmul.f32 0.2, %v823_v26  ;;  %v784_v38 = vadd.f32 %v783_v33, %v410_v17  ;;  %v827_v39 = vadd.f32 %v826_v34, %v418_v18 }
 0x230   :  { %v833_v40 = vmul.f32 0.2, %v782_v31  ;;  %v835_v41 = vmul.f32 0.2, %v825_v32  ;;  %v837_v44 = vmax.f32 %v778_v21, %v829_v29  ;;  %v839_v45 = vmax.f32 %v821_v22, %v831_v30 }
 0x231   :  { %v834_v42 = vmul.f32 0.2, %v784_v38  ;;  %v836_v43 = vmul.f32 0.2, %v827_v39  ;;  %v838_v48 = vmax.f32 %v780_v25, %v830_v36  ;;  %v840_v49 = vmax.f32 %v823_v26, %v832_v37 }
 0x232   :  { %v841_v46 = vmax.f32 %v782_v31, %v833_v40  ;;  %v843_v47 = vmax.f32 %v825_v32, %v835_v41 }
 0x233   :  { %v842_v50 = vmax.f32 %v784_v38, %v834_v42  ;;  %v844_v51 = vmax.f32 %v827_v39, %v836_v43 }
 0x234   :  { %v845_v52 = vpack.c.bf16 %v841_v46, %v837_v44  ;;  %v847_v53 = vpack.c.bf16 %v843_v47, %v839_v45 }
 0x235   :  { %v846_v54 = vpack.c.bf16 %v842_v50, %v838_v48  ;;  %v848_v56 = vpack.c.bf16 %v844_v51, %v840_v49 }
 0x237   :  { %1144 = vmatprep.mubr.bf16.mxu1 %v846_v54 }
 0x238   :  { %1145 = vmatmul.mubr.bf16.vlgmr.msra.gmra.mrb[4].mxu1 %v845_v52 }
 0x239   :  { %1371 = vmatpush3.bf16.msra.mxu1 %v1565_v55  ;;  %1185 = vmatprep.mubr.bf16.mxu1 %v848_v56 }
 0x23a   :  { %1372 = vmatprep.subr.bf16.mxu1 %v1566_v57 }
 0x23d   :  { %1373 = vmatpush3.bf16.msra.mxu1 %v1567_v58 }
 0x23e   :  { %1374 = vmatprep.subr.bf16.mxu1 %v1568_v59 }
 0x241   :  { %1375 = vmatpush3.bf16.msra.mxu1 %v1569_v60 }
 0x242   :  { %1376 = vmatprep.subr.bf16.mxu1 %v1570_v61 }
 0x245   :  { %1377 = vmatpush3.bf16.msra.mxu1 %v1571_v62 }
 0x246   :  { %1378 = vmatprep.subr.bf16.mxu1 %v1572_v63 }
 0x249   :  { %1379 = vmatpush3.bf16.msra.mxu1 %v1573_v0 }
 0x24a   :  { %1380 = vmatprep.subr.bf16.mxu1 %v1574_v1 }
 0x24d   :  { %1381 = vmatpush3.bf16.msra.mxu1 %v1575_v2 }
 0x24e   :  { %1382 = vmatprep.subr.bf16.mxu1 %v1576_v3 }
 0x251   :  { %1383 = vmatpush3.bf16.msra.mxu1 %v1577_v4 }
 0x252   :  { %1384 = vmatprep.subr.bf16.mxu1 %v1578_v5 }
 0x255   :  { %1385 = vmatpush3.bf16.msra.mxu1 %v1579_v6 }
 0x258   :  { %1186 = vmatmul.mubr.bf16.vlgmr.msra.gmra.mrb[8].mxu1 %v847_v53 }
 0x30b   :  { %v1364_v7 = vpop.f32.mrb[4].mxu1 }
 0x30c   :  { %v1365_v8 = vpop.f32.mrb[5].mxu1 }
 0x30d   :  { %v1366_v9 = vadd.f32 %v1365_v8, %v1364_v7  ;;  %v1367_v10 = vpop.f32.mrb[6].mxu1 }
 0x30e   :  { %v1368_v11 = vpop.f32.mrb[7].mxu1 }
 0x30f   :  { %v1369_v12 = vadd.f32 %v1368_v11, %v1367_v10  ;;  %v1147_v17 = vadd.f32 %v1366_v9, %v1315_v13 }
 0x311   :  { %v1150_v21 = vadd.f32 %v1369_v12, %v1315_v13 }
 0x32b   :  { %v1386_v15 = vpop.f32.mrb[8].mxu1 }
 0x32c   :  { %v1387_v16 = vpop.f32.mrb[9].mxu1 }
 0x32d   :  { %v1388_v18 = vadd.f32 %v1387_v16, %v1386_v15  ;;  %v1389_v19 = vpop.f32.mrb[10].mxu1 }
 0x32e   :  { %v1390_v20 = vpop.f32.mrb[11].mxu1 }
 0x32f   :  { %v1188_v22 = vadd.f32 %v1388_v18, %v1147_v17  ;;  %v1391_v23 = vadd.f32 %v1390_v20, %v1389_v19 }
 0x331   :  { %v1199_v24 = vsel %vm1196_vm0, 0.0, %v1188_v22  ;;  %v1191_v25 = vadd.f32 %v1391_v23, %v1150_v21 }
 0x332   :  { %v1201_v26 = vmul.f32 0.5, %v1199_v24 }
 0x333   :  { %v1200_v27 = vsel %vm1196_vm0, 0.0, %v1191_v25 }
 0x334   :  { %v1203_v28 = vmul.f32 1.442695, %v1201_v26  ;;  %v1202_v29 = vmul.f32 0.5, %v1200_v27 }
 0x336   :  { %1580 = vpow2.f32 %v1203_v28  ;;  %v1205_v35 = vmul.f32 1.442695, %v1202_v29 }
 0x338   :  { %1582 = vpow2.f32 %v1205_v35 }
 0x340   :  { %v1581_v30 = vpop.eup %1580 }
 0x341   :  { %v1207_v31 = vsel %vm1196_vm0, %v1188_v22, %v1581_v30 }
 0x342   :  { %v1583_v32 = vpop.eup %1582  ;;  %1209 = vst [vmem:[%s1779_s7] sm:$0xff] %v1207_v31 }
 0x343   :  { %v1208_v33 = vsel %vm1196_vm0, %v1191_v25, %v1583_v32 }
 0x344   :  { %1210 = vst [vmem:[%s1779_s7 + $0x8] sm:$0xff] %v1208_v33 }
 0x345   :  { %1215 = vsyncpa [#allocation3], 1 }
 0x346   :  { %1216 = vsyncpa [#allocation5], 1 }

</bundles_post_ra>
